<compile_context>
chip_gen: v6e
topology: v6e:2x2x1
jax: 0.10.0
libtpu: 0.0.40
codegen_flags: <defaults>
</compile_context>

<pallas_src>
import jax
import jax.numpy as jnp
from jax import lax
from jax.experimental import pallas as pl
from jax.experimental.pallas import tpu as pltpu


def _round_up(x, m):
    return (x + m - 1) // m * m


# ----------------------------------------------------------------------------
# Kernel: fused  W1 @ x^T + b1 -> tanh -> sublane reduce against Re(w2) + Re(b2)
# ----------------------------------------------------------------------------
def two_layer_kernel(x_ref, w1_ref, b1_ref, w2_ref, b2_ref, o_ref):
    # layer1, transposed: contract w1 (n_hidden, dim) with x (TB, dim) over dim
    # -> (n_hidden, TB).  Batch lands on lanes; MXU transposes the RHS for free.
    h_t = lax.dot_general(
        w1_ref[...], x_ref[...],
        dimension_numbers=(((1,), (1,)), ((), ())),
        preferred_element_type=jnp.float32,
    )
    # Bias + activation at full lane occupancy (VPU add, EUP tanh), in f32.
    h_t = jnp.tanh(h_t + b1_ref[...])                      # b1: (n_hidden, 1) column

    # layer2 (out_features == 1): per-sublane scale by Re(w2) column, then a
    # single sublane reduction -> lane-dense (1, TB).  No second MXU pass.
    # TODO(synk): if bundle dumps show the vmatmul push slot binding at huge B,
    # pack 4 batch rows per 128-lane vreg against a block-diagonal w1 replica.
    y = jnp.sum(h_t * w2_ref[...], axis=0, keepdims=True)  # (1, TB)
    o_ref[...] = y + b2_ref[0, 0]                          # scalar bias from SMEM


# ----------------------------------------------------------------------------
# Wrapper
# ----------------------------------------------------------------------------
def two_layer_nn(x, w1, b1, w2, b2, *, matmul_dtype=jnp.float32):
    """Forward pass of TwoLayerNN (PyTorch parameter conventions).

      x  : (B, dim)          float32
      w1 : (n_hidden, dim)   float32   (layer1.weight)
      b1 : (n_hidden,)       float32   (layer1.bias)
      w2 : (1, n_hidden)     complex64 or float32 (layer2.weight)
      b2 : (1,)              complex64 or float32 (layer2.bias)

    matmul_dtype: dtype for the MXU operands (x, w1).  Use jnp.bfloat16 on
    v6e/v7x for cheaper feeds; bias/tanh/reduce stay f32 regardless.

    Returns (B, 1) float32 == layer2(tanh(layer1(x))).real
    """
    B, dim = x.shape
    n_hidden = w1.shape[0]

    # One-time glue outside the hot path; real-part algebra is exact.
    w1_m = w1.astype(matmul_dtype)                                   # (n_hidden, dim), native
    b1_c = b1.reshape(n_hidden, 1).astype(jnp.float32)               # sublane column
    w2_c = jnp.real(w2).reshape(n_hidden, 1).astype(jnp.float32)     # sublane column
    b2_s = jnp.real(b2).reshape(1, 1).astype(jnp.float32)            # scalar -> SMEM

    # Batch tiling: TB a multiple of 128 (covers bf16's 16-row sublane tile),
    # large enough to amortize per-step overhead, capped so double-buffered
    # lane-padded f32 x tiles stay inside a 32 MiB VMEM budget on all chips.
    TB = min(8192, _round_up(B, 128))
    Bp = _round_up(B, TB)
    # v7x has 2 TensorCores: if a large batch collapsed to one grid step,
    # split it so the "parallel" batch axis can shard across both cores.
    if Bp // TB == 1 and TB > 256:
        TB = _round_up(TB // 2, 128)
        Bp = _round_up(B, TB)

    x_m = x.astype(matmul_dtype)
    if Bp != B:
        x_m = jnp.pad(x_m, ((0, Bp - B), (0, 0)))

    out = pl.pallas_call(
        two_layer_kernel,
        out_shape=jax.ShapeDtypeStruct((1, Bp), jnp.float32),        # lane-dense slab
        grid=(Bp // TB,),
        in_specs=[
            pl.BlockSpec((TB, dim), lambda i: (i, 0)),               # x: tiled over batch
            pl.BlockSpec((n_hidden, dim), lambda i: (0, 0)),         # w1: resident
            pl.BlockSpec((n_hidden, 1), lambda i: (0, 0)),           # b1 column: resident
            pl.BlockSpec((n_hidden, 1), lambda i: (0, 0)),           # Re(w2) column: resident
            pl.BlockSpec(memory_space=pltpu.MemorySpace.SMEM),       # Re(b2): SMEM scalar
        ],
        out_specs=pl.BlockSpec((1, TB), lambda i: (0, i)),
        compiler_params=pltpu.CompilerParams(
            dimension_semantics=("parallel",),     # batch tiles shard across TCs (v7x)
            vmem_limit_bytes=32 * 1024 * 1024,     # headroom for v5e f32 at TB=8192
        ),
    )(x_m, w1_m, b1_c, w2_c, b2_s)

    # Padded rows hold tanh(b1).Re(w2)+Re(b2) != 0; they are discarded here.
    # Never reduce over the padded slab without this slice.
    return out.reshape(Bp)[:B].reshape(B, 1)


# ----------------------------------------------------------------------------
# Driver
# ----------------------------------------------------------------------------
if __name__ == "__main__":
    # Module config: activation=tanh, n_hidden=32, dim=32, bias=True, cplx=True
    B, dim, n_hidden = 8, 32, 32

    key = jax.random.PRNGKey(0)
    k_x, k_w1, k_b1, k_w2r, k_w2i, k_b2r, k_b2i = jax.random.split(key, 7)

    bound1 = 1.0 / jnp.sqrt(dim)
    bound2 = 1.0 / jnp.sqrt(n_hidden)
    x  = jax.random.normal(k_x, (B, dim), dtype=jnp.float32)
    w1 = jax.random.uniform(k_w1, (n_hidden, dim), jnp.float32, -bound1, bound1)
    b1 = jax.random.uniform(k_b1, (n_hidden,), jnp.float32, -bound1, bound1)
    w2 = (jax.random.uniform(k_w2r, (1, n_hidden), jnp.float32, -bound2, bound2)
          + 1j * jax.random.uniform(k_w2i, (1, n_hidden), jnp.float32, -bound2, bound2)
          ).astype(jnp.complex64)
    b2 = (jax.random.uniform(k_b2r, (1,), jnp.float32, -bound2, bound2)
          + 1j * jax.random.uniform(k_b2i, (1,), jnp.float32, -bound2, bound2)
          ).astype(jnp.complex64)

    # Pure-JAX reference (full complex math, then .real) to confirm semantics.
    h_ref = jnp.tanh(x @ w1.T + b1)
    y_ref = jnp.real(h_ref.astype(jnp.complex64) @ w2.T + b2)

    # f32 MXU operands: exact path, tight tolerance.
    out_f32 = jax.block_until_ready(two_layer_nn(x, w1, b1, w2, b2))
    assert out_f32.shape == (B, 1)
    assert jnp.allclose(out_f32, y_ref, atol=1e-5, rtol=1e-5)

    # bf16 MXU operands (v6e/v7x feed optimization): looser tolerance.
    out_bf16 = jax.block_until_ready(
        two_layer_nn(x, w1, b1, w2, b2, matmul_dtype=jnp.bfloat16))
    assert out_bf16.shape == (B, 1)
    assert jnp.allclose(out_bf16, y_ref, atol=2e-2, rtol=1e-2)

    print("KERNEL_OK")
</pallas_src>

<mosaic_0001>
module attributes {stable_mosaic.version = 11 : i64} {
  func.func @two_layer_kernel(%arg0: i32, %arg1: memref<128x32xf32, #tpu.memory_space<vmem>>, %arg2: memref<32x32xf32, #tpu.memory_space<vmem>>, %arg3: memref<32x1xf32, #tpu.memory_space<vmem>>, %arg4: memref<32x1xf32, #tpu.memory_space<vmem>>, %arg5: memref<1x1xf32, #tpu.memory_space<smem>>, %arg6: memref<1x128xf32, #tpu.memory_space<vmem>>) attributes {dimension_semantics = [#tpu.dimension_semantics<parallel>], iteration_bounds = array<i64: 1>, scalar_prefetch = 0 : i64, scratch_operands = 0 : i64, tpu.core_type = #tpu.core_type<tc>, window_params = [{transform_indices = @transform_0, window_bounds = array<i64: 128, 32>}, {pipeline_mode = #tpu.pipeline_mode<synchronous>, transform_indices = @transform_1, window_bounds = array<i64: 32, 32>}, {pipeline_mode = #tpu.pipeline_mode<synchronous>, transform_indices = @transform_2, window_bounds = array<i64: 32, 1>}, {pipeline_mode = #tpu.pipeline_mode<synchronous>, transform_indices = @transform_3, window_bounds = array<i64: 32, 1>}, {transform_indices = @transform_4, window_bounds = array<i64: 1, 1>}, {transform_indices = @transform_5, window_bounds = array<i64: 1, 128>}]} {
    %c0 = arith.constant 0 : index
    %c0_0 = arith.constant 0 : index
    %0 = vector.load %arg2[%c0, %c0_0] : memref<32x32xf32, #tpu.memory_space<vmem>>, vector<32x32xf32>
    %c0_1 = arith.constant 0 : index
    %c0_2 = arith.constant 0 : index
    %1 = vector.load %arg1[%c0_1, %c0_2] : memref<128x32xf32, #tpu.memory_space<vmem>>, vector<128x32xf32>
    %cst = arith.constant dense<0.000000e+00> : vector<32x128xf32>
    %2 = tpu.matmul %0, %1, %cst {dimension_numbers = #tpu.dot_dimension_numbers<[1], [1], [0], [0], [0, 0, 1, 0], [], []>} : vector<32x32xf32>, vector<128x32xf32>, vector<32x128xf32> -> vector<32x128xf32>
    %c0_3 = arith.constant 0 : index
    %c0_4 = arith.constant 0 : index
    %3 = vector.load %arg3[%c0_3, %c0_4] : memref<32x1xf32, #tpu.memory_space<vmem>>, vector<32x1xf32>
    %4 = vector.broadcast %3 : vector<32x1xf32> to vector<32x128xf32>
    %5 = arith.addf %2, %4 : vector<32x128xf32>
    %6 = math.tanh %5 : vector<32x128xf32>
    %c0_5 = arith.constant 0 : index
    %c0_6 = arith.constant 0 : index
    %7 = vector.load %arg4[%c0_5, %c0_6] : memref<32x1xf32, #tpu.memory_space<vmem>>, vector<32x1xf32>
    %8 = vector.broadcast %7 : vector<32x1xf32> to vector<32x128xf32>
    %9 = arith.mulf %6, %8 : vector<32x128xf32>
    %cst_7 = arith.constant dense<0.000000e+00> : vector<128xf32>
    %10 = vector.multi_reduction <add>, %9, %cst_7 [0] : vector<32x128xf32> to vector<128xf32>
    %11 = vector.shape_cast %10 : vector<128xf32> to vector<1x128xf32>
    %c0_8 = arith.constant 0 : index
    %c0_9 = arith.constant 0 : index
    %12 = memref.load %arg5[%c0_8, %c0_9] : memref<1x1xf32, #tpu.memory_space<smem>>
    %13 = vector.broadcast %12 : f32 to vector<1x128xf32>
    %14 = arith.addf %11, %13 : vector<1x128xf32>
    %c0_10 = arith.constant 0 : index
    %c0_11 = arith.constant 0 : index
    %15 = vector.load %arg6[%c0_10, %c0_11] : memref<1x128xf32, #tpu.memory_space<vmem>>, vector<1x128xf32>
    tpu.vector_store %arg6[%c0_10, %c0_11], %14 {strides = array<i32>} : memref<1x128xf32, #tpu.memory_space<vmem>>, vector<1x128xf32>,
    return
  }
  func.func @transform_0(%arg0: i32) -> (i32, i32) {
    %c0_i32 = arith.constant 0 : i32
    %c0_i32_0 = arith.constant 0 : i32
    return %arg0, %c0_i32 : i32, i32
  }
  func.func @transform_1(%arg0: i32) -> (i32, i32) {
    %c0_i32 = arith.constant 0 : i32
    %c0_i32_0 = arith.constant 0 : i32
    %c0_i32_1 = arith.constant 0 : i32
    return %c0_i32, %c0_i32_0 : i32, i32
  }
  func.func @transform_2(%arg0: i32) -> (i32, i32) {
    %c0_i32 = arith.constant 0 : i32
    %c0_i32_0 = arith.constant 0 : i32
    %c0_i32_1 = arith.constant 0 : i32
    return %c0_i32, %c0_i32_0 : i32, i32
  }
  func.func @transform_3(%arg0: i32) -> (i32, i32) {
    %c0_i32 = arith.constant 0 : i32
    %c0_i32_0 = arith.constant 0 : i32
    %c0_i32_1 = arith.constant 0 : i32
    return %c0_i32, %c0_i32_0 : i32, i32
  }
  func.func @transform_4(%arg0: i32) -> (i32, i32) {
    %c0_i32 = arith.constant 0 : i32
    %c0_i32_0 = arith.constant 0 : i32
    %c0_i32_1 = arith.constant 0 : i32
    return %c0_i32, %c0_i32_0 : i32, i32
  }
  func.func @transform_5(%arg0: i32) -> (i32, i32) {
    %c0_i32 = arith.constant 0 : i32
    %c0_i32_0 = arith.constant 0 : i32
    return %c0_i32, %arg0 : i32, i32
  }
}

</mosaic_0001>

<bundles_post_ra>
// kernel: tpu_custom_call.1
= control target key start
LH: loop header
LB: loop body
LE: loop exit
PB: predicated region body
PF: predicated region fallthrough
CT: control target
= control target key end

     0   :  { %vm66_vm0 = vcmask 261120   ;;  %v415_v3 = vmov 0   ;;  %s605_s0 = inlined_call_operand.vmem [shape: f32[128,32], index: 0, kind: input, shape index: {}]   ;;  %s606_s1 = inlined_call_operand.vmem [shape: f32[32,32], index: 1, kind: input, shape index: {}]   ;;  %s607_s2 = inlined_call_operand.vmem [shape: f32[32,1], index: 2, kind: input, shape index: {}]   ;;  %s608_s3 = inlined_call_operand.vmem [shape: f32[32,1], index: 3, kind: input, shape index: {}]   ;;  %s609_s4 = inlined_call_operand.<no memory space> [shape: f32[1,1], index: 4, kind: input, shape index: {}]   ;;  %s610_s5 = inlined_call_operand.hbm [shape: f32[1,128], index: 5, kind: output, shape index: {}]  }
   0x1   :  { %v41_v0 = vld [vmem:[%s605_s0 + $0x78] sm:$0xff]  ;;  %v40_v1 = vld [vmem:[%s605_s0 + $0x70] sm:$0xff]  ;;  %v39_v2 = vld [vmem:[%s605_s0 + $0x68] sm:$0xff]  ;;  %383 = vset.pattern.permute.xlu0 %v415_v3  ;;  %384 = vset.pattern.permute.xlu1 %v415_v3 }
   0x2   :  { %311 = vmatprep.subr.msk.mxu0 %vm66_vm0, %v41_v0  ;;  %349 = vmatprep.subr.msk.mxu1 %vm66_vm0, %v41_v0  ;;  %v22_v4 = vld [vmem:[%s606_s1] sm:$0xff]  ;;  %v24_v5 = vld [vmem:[%s606_s1 + $0x10] sm:$0xff] }
   0x3   :  { %312 = vmatpush3.xpose.msk.msra.mxu0 %vm66_vm0, %v41_v0  ;;  %365 = vmatpush3.xpose.msk.msra.mxu1 %vm66_vm0, %v41_v0  ;;  %v42_v6 = vld [vmem:[%s607_s2] sm:$0xff]  ;;  %v44_v7 = vld [vmem:[%s607_s2 + $0x10] sm:$0xff] }
   0x4   :  { %313 = vmatprep.subr.msk.mxu0 %vm66_vm0, %v40_v1  ;;  %350 = vmatprep.subr.msk.mxu1 %vm66_vm0, %v40_v1  ;;  %v38_v8 = vld [vmem:[%s605_s0 + $0x60] sm:$0xff] }
   0x5   :  { %343 = vmatprep.mubr.msk.f32.mxu0 %vm66_vm0, %v22_v4  ;;  %346 = vmatprep.mubr.msk.f32.mxu1 %vm66_vm0, %v24_v5 }
   0x6   :  { %48 = vperm.xlu0 %383, %v42_v6   ;;  %58 = vperm.xlu1 %384, %v44_v7  }
   0x7   :  { %314 = vmatpush3.xpose.msk.msra.mxu0 %vm66_vm0, %v40_v1  ;;  %366 = vmatpush3.xpose.msk.msra.mxu1 %vm66_vm0, %v40_v1 }
   0x8   :  { %315 = vmatprep.subr.msk.mxu0 %vm66_vm0, %v39_v2  ;;  %351 = vmatprep.subr.msk.mxu1 %vm66_vm0, %v39_v2 }
   0x9   :  { %11 = vsyncpa [#allocation4], 0  ;;  %v43_v9 = vld [vmem:[%s607_s2 + $0x8] sm:$0xff]  ;;  %v45_v10 = vld [vmem:[%s607_s2 + $0x18] sm:$0xff]  ;;  %v254_v61 = vstv %s609_s4  ;;  %s416_s21 = smov [#allocation3]  }
   0xa   :  { %v37_v11 = vld [vmem:[%s605_s0 + $0x58] sm:$0xff]  ;;  %53 = vperm.xlu0 %383, %v43_v9   ;;  %63 = vperm.xlu1 %384, %v45_v10   ;;  %v216_v12 = vld [vmem:[%s608_s3] sm:$0xff]  ;;  %v217_v13 = vld [vmem:[%s608_s3 + $0x8] sm:$0xff]  ;;  %s263_s22 = sshll.u32 %s416_s21, 4  ;;  %s264_s22 = int_to_ptr.vmem [resolvable:$true] %s263_s22 }
   0xb   :  { %316 = vmatpush3.xpose.msk.msra.mxu0 %vm66_vm0, %v39_v2  ;;  %367 = vmatpush3.xpose.msk.msra.mxu1 %vm66_vm0, %v39_v2  ;;  %v36_v14 = vld [vmem:[%s605_s0 + $0x50] sm:$0xff]  ;;  %v219_v16 = vld [vmem:[%s608_s3 + $0x18] sm:$0xff]  ;;  %v35_v17 = vld [vmem:[%s605_s0 + $0x48] sm:$0xff]  ;;  %s393_s23 = scalar_lea.vmem %s264_s22, 16  ;;  %s397_s24 = scalar_lea.vmem %s264_s22, 32 }
   0xc   :  { %317 = vmatprep.subr.msk.mxu0 %vm66_vm0, %v38_v8  ;;  %352 = vmatprep.subr.msk.mxu1 %vm66_vm0, %v38_v8  ;;  %v218_v15 = vld [vmem:[%s608_s3 + $0x10] sm:$0xff]  ;;  %v34_v18 = vld [vmem:[%s605_s0 + $0x40] sm:$0xff]  ;;  %v33_v19 = vld [vmem:[%s605_s0 + $0x38] sm:$0xff]  ;;  %p394_p0 = scmp.ne.s32.totalorder %s264_s22, %s393_s23  ;;  %p398_p1 = scmp.lt.s32.totalorder %s264_s22, %s264_s22 }
   0xd   :  { %v32_v20 = vld [vmem:[%s605_s0 + $0x30] sm:$0xff]  ;;  %v31_v21 = vld [vmem:[%s605_s0 + $0x28] sm:$0xff]  ;;  %v30_v22 = vld [vmem:[%s605_s0 + $0x20] sm:$0xff]  ;;  %p399_p2 = scmp.lt.s32.totalorder %s397_s24, %s393_s23 }
   0xe   :  { %222 = vperm.xlu0 %383, %v216_v12   ;;  %227 = vperm.xlu1 %384, %v217_v13   ;;  %v29_v23 = vld [vmem:[%s605_s0 + $0x18] sm:$0xff]  ;;  %v28_v24 = vld [vmem:[%s605_s0 + $0x10] sm:$0xff]  ;;  %v27_v25 = vld [vmem:[%s605_s0 + $0x8] sm:$0xff] }
   0xf   :  { %318 = vmatpush3.xpose.msk.msra.mxu0 %vm66_vm0, %v38_v8  ;;  %368 = vmatpush3.xpose.msk.msra.mxu1 %vm66_vm0, %v38_v8  ;;  %v26_v26 = vld [vmem:[%s605_s0] sm:$0xff]  ;;  %v23_v27 = vld [vmem:[%s606_s1 + $0x8] sm:$0xff]  ;;  %v25_v28 = vld [vmem:[%s606_s1 + $0x18] sm:$0xff]  ;;  %p400_p3 = por %p399_p2, %p398_p1 }
  0x10   :  { %319 = vmatprep.subr.msk.mxu0 %vm66_vm0, %v37_v11  ;;  %353 = vmatprep.subr.msk.mxu1 %vm66_vm0, %v37_v11 }
  0x11   :  { %p401_p4 = pnand %p400_p3, %p394_p0 }
  0x12   :  { %232 = vperm.xlu0 %383, %v218_v15   ;;  %237 = vperm.xlu1 %384, %v219_v16  }
  0x13   :  { %320 = vmatpush3.xpose.msk.msra.mxu0 %vm66_vm0, %v37_v11  ;;  %369 = vmatpush3.xpose.msk.msra.mxu1 %vm66_vm0, %v37_v11 }
  0x14   :  { %321 = vmatprep.subr.msk.mxu0 %vm66_vm0, %v36_v14  ;;  %354 = vmatprep.subr.msk.mxu1 %vm66_vm0, %v36_v14 }
  0x17   :  { %322 = vmatpush3.xpose.msk.msra.mxu0 %vm66_vm0, %v36_v14  ;;  %370 = vmatpush3.xpose.msk.msra.mxu1 %vm66_vm0, %v36_v14 }
  0x18   :  { %323 = vmatprep.subr.msk.mxu0 %vm66_vm0, %v35_v17  ;;  %355 = vmatprep.subr.msk.mxu1 %vm66_vm0, %v35_v17 }
  0x1b   :  { %324 = vmatpush3.xpose.msk.msra.mxu0 %vm66_vm0, %v35_v17  ;;  %371 = vmatpush3.xpose.msk.msra.mxu1 %vm66_vm0, %v35_v17 }
  0x1c   :  { %325 = vmatprep.subr.msk.mxu0 %vm66_vm0, %v34_v18  ;;  %356 = vmatprep.subr.msk.mxu1 %vm66_vm0, %v34_v18 }
  0x1f   :  { %326 = vmatpush3.xpose.msk.msra.mxu0 %vm66_vm0, %v34_v18  ;;  %372 = vmatpush3.xpose.msk.msra.mxu1 %vm66_vm0, %v34_v18 }
  0x20   :  { %327 = vmatprep.subr.msk.mxu0 %vm66_vm0, %v33_v19  ;;  %357 = vmatprep.subr.msk.mxu1 %vm66_vm0, %v33_v19 }
  0x23   :  { %328 = vmatpush3.xpose.msk.msra.mxu0 %vm66_vm0, %v33_v19  ;;  %373 = vmatpush3.xpose.msk.msra.mxu1 %vm66_vm0, %v33_v19 }
  0x24   :  { %329 = vmatprep.subr.msk.mxu0 %vm66_vm0, %v32_v20  ;;  %358 = vmatprep.subr.msk.mxu1 %vm66_vm0, %v32_v20 }
  0x27   :  { %330 = vmatpush3.xpose.msk.msra.mxu0 %vm66_vm0, %v32_v20  ;;  %374 = vmatpush3.xpose.msk.msra.mxu1 %vm66_vm0, %v32_v20 }
  0x28   :  { %331 = vmatprep.subr.msk.mxu0 %vm66_vm0, %v31_v21  ;;  %359 = vmatprep.subr.msk.mxu1 %vm66_vm0, %v31_v21 }
  0x2b   :  { %332 = vmatpush3.xpose.msk.msra.mxu0 %vm66_vm0, %v31_v21  ;;  %375 = vmatpush3.xpose.msk.msra.mxu1 %vm66_vm0, %v31_v21 }
  0x2c   :  { %333 = vmatprep.subr.msk.mxu0 %vm66_vm0, %v30_v22  ;;  %360 = vmatprep.subr.msk.mxu1 %vm66_vm0, %v30_v22 }
  0x2f   :  { %334 = vmatpush3.xpose.msk.msra.mxu0 %vm66_vm0, %v30_v22  ;;  %376 = vmatpush3.xpose.msk.msra.mxu1 %vm66_vm0, %v30_v22 }
  0x30   :  { %335 = vmatprep.subr.msk.mxu0 %vm66_vm0, %v29_v23  ;;  %361 = vmatprep.subr.msk.mxu1 %vm66_vm0, %v29_v23 }
  0x33   :  { %336 = vmatpush3.xpose.msk.msra.mxu0 %vm66_vm0, %v29_v23  ;;  %377 = vmatpush3.xpose.msk.msra.mxu1 %vm66_vm0, %v29_v23 }
  0x34   :  { %337 = vmatprep.subr.msk.mxu0 %vm66_vm0, %v28_v24  ;;  %362 = vmatprep.subr.msk.mxu1 %vm66_vm0, %v28_v24 }
  0x37   :  { %338 = vmatpush3.xpose.msk.msra.mxu0 %vm66_vm0, %v28_v24  ;;  %378 = vmatpush3.xpose.msk.msra.mxu1 %vm66_vm0, %v28_v24 }
  0x38   :  { %339 = vmatprep.subr.msk.mxu0 %vm66_vm0, %v27_v25  ;;  %363 = vmatprep.subr.msk.mxu1 %vm66_vm0, %v27_v25 }
  0x3b   :  { %340 = vmatpush3.xpose.msk.msra.mxu0 %vm66_vm0, %v27_v25  ;;  %379 = vmatpush3.xpose.msk.msra.mxu1 %vm66_vm0, %v27_v25 }
  0x3c   :  { %341 = vmatprep.subr.msk.mxu0 %vm66_vm0, %v26_v26  ;;  %364 = vmatprep.subr.msk.mxu1 %vm66_vm0, %v26_v26 }
  0x3f   :  { %342 = vmatpush3.xpose.msk.msra.mxu0 %vm66_vm0, %v26_v26  ;;  %380 = vmatpush3.xpose.msk.msra.mxu1 %vm66_vm0, %v26_v26 }
  0x42   :  { %344 = vmatmul.mubr.msk.f32.vlgmr.msra.gmra.mxu0 %vm66_vm0, %v23_v27  ;;  %347 = vmatmul.mubr.msk.f32.vlgmr.msra.gmra.mxu1 %vm66_vm0, %v25_v28 }
  0x81   :  { %v49_v29 = vpop.permute.xlu0 %48  ;;  %v59_v30 = vpop.permute.xlu1 %58 }
  0x85   :  { %v54_v31 = vpop.permute.xlu0 %53  ;;  %v64_v34 = vpop.permute.xlu1 %63 }
  0x89   :  { %v223_v41 = vpop.permute.xlu0 %222  ;;  %v228_v43 = vpop.permute.xlu1 %227 }
  0x8d   :  { %v233_v49 = vpop.permute.xlu0 %232  ;;  %v238_v52 = vpop.permute.xlu1 %237 }
 0x102   :  { %v345_v32 = vpop.f32.mrf.mxu0  ;;  %v348_v33 = vpop.f32.mrf.mxu1 }
 0x103   :  { %v199_v35 = vadd.f32 %v345_v32, %v54_v31  ;;  %v209_v38 = vadd.f32 %v348_v33, %v64_v34 }
 0x104   :  { %v193_v36 = vpop.f32.mrf.mxu0  ;;  %v203_v37 = vpop.f32.mrf.mxu1 }
 0x105   :  { %385 = vtanh.f32 %v199_v35  ;;  %v194_v39 = vadd.f32 %v193_v36, %v49_v29  ;;  %v204_v40 = vadd.f32 %v203_v37, %v59_v30 }
 0x107   :  { %387 = vtanh.f32 %v194_v39 }
 0x108   :  { %389 = vtanh.f32 %v204_v40 }
 0x109   :  { %391 = vtanh.f32 %v209_v38 }
 0x112   :  { %v386_v42 = vpop.eup %385 }
 0x113   :  { %v241_v46 = vmul.f32 %v386_v42, %v228_v43 }
 0x114   :  { %v388_v44 = vpop.eup %387 }
 0x115   :  { %v390_v45 = vpop.eup %389  ;;  %v240_v47 = vmul.f32 %v388_v44, %v223_v41 }
 0x116   :  { %v392_v48 = vpop.eup %391  ;;  %v242_v50 = vmul.f32 %v390_v45, %v233_v49 }
 0x117   :  { %v244_v51 = vadd.f32 %v241_v46, %v240_v47  ;;  %v243_v53 = vmul.f32 %v392_v48, %v238_v52 }
 0x119   :  { %v245_v54 = vadd.f32 %v244_v51, %v242_v50 }
 0x11b   :  { %v246_v55 = vadd.f32 %v245_v54, %v243_v53 }
 0x11d   :  { %v247_v56 = vrot.slane %v246_v55, 4 }
 0x11f   :  { %v248_v57 = vadd.f32 %v247_v56, %v246_v55 }
 0x121   :  { %v249_v58 = vrot.slane %v248_v57, 2 }
 0x123   :  { %v250_v59 = vadd.f32 %v249_v58, %v248_v57 }
 0x125   :  { %v251_v60 = vrot.slane %v250_v59, 1 }
 0x127   :  { %v252_v62 = vadd.f32 %v251_v60, %v250_v59 }
 0x129   :  { %v255_v63 = vadd.f32 %v254_v61, %v252_v62 }
 0x12b   :  { %256 = vst [vmem:[#allocation3] sm:$0x1] %v255_v63 }
 0x12c   :  { %404 = shalt.err (!%p401_p4)
}
 0x12d   :  { %266 = dma.vmem_to_hbm [thread:$0]  %s264_s22, 16, %s610_s5, [#allocation4]  }
 0x12e   :  { %413 = dma.done.wait [#allocation4], 16  }
 0x12f   :  { %414 = vsyncadd [#allocation4], 4294967280 }
 0x130   :  { %270 = vsyncpa [#allocation4], 1 }

</bundles_post_ra>
